<compile_context>
chip_gen: v5e
topology: v5e:2x2
jax: 0.10.0
libtpu: 0.0.40
codegen_flags: <defaults>
</compile_context>

<pallas_src>
import jax
import jax.numpy as jnp
from jax.experimental import pallas as pl
from jax.experimental.pallas import tpu as pltpu

HIDDEN = 64          # logical hidden width of the PyTorch module
HIDDEN_PAD = 128     # lane-dense padded hidden width


def _round_up(x, m):
    return (x + m - 1) // m * m


def _actor_kernel(state_ref,
                  w1_ref, b1_ref,
                  w2_ref, b2_ref,
                  wh_ref, bh_ref,
                  lo_ref, hi_ref,
                  out_ref):
    x = state_ref[...]                                            # bf16 [tb, state_dim]

    # Layer 1: bf16 MXU matmul, f32 accumulate; bias + ReLU in f32.
    h1 = jnp.dot(x, w1_ref[...], preferred_element_type=jnp.float32)
    h1 = jnp.maximum(h1 + b1_ref[...], 0.0)

    # Layer 2 (padded hidden lanes stay exactly 0: zero weights, zero bias, relu(0)=0).
    h2 = jnp.dot(h1.astype(jnp.bfloat16), w2_ref[...],
                 preferred_element_type=jnp.float32)
    h2 = jnp.maximum(h2 + b2_ref[...], 0.0)

    # Fused heads: one matmul producing [mean | log_std]  -> [tb, 2*action_dim].
    y = jnp.dot(h2.astype(jnp.bfloat16), wh_ref[...],
                preferred_element_type=jnp.float32) + bh_ref[...]

    # Per-lane clamp via precomputed bound rows:
    #   mean lanes: (-inf, +inf)   log_std lanes: (-20, 2)
    out_ref[...] = jnp.minimum(jnp.maximum(y, lo_ref[...]), hi_ref[...])


def init_params(key, state_dim, action_dim, hidden=HIDDEN):
    """nn.Linear-style init; weights stored as [in, out], biases as [1, out]."""
    ks = jax.random.split(key, 8)

    def linear(kw, kb, fan_in, fan_out):
        bound = 1.0 / jnp.sqrt(fan_in)
        w = jax.random.uniform(kw, (fan_in, fan_out), jnp.float32, -bound, bound)
        b = jax.random.uniform(kb, (1, fan_out), jnp.float32, -bound, bound)
        return w, b

    w1, b1 = linear(ks[0], ks[1], state_dim, hidden)
    w2, b2 = linear(ks[2], ks[3], hidden, hidden)
    wm, bm = linear(ks[4], ks[5], hidden, action_dim)
    ws, bs = linear(ks[6], ks[7], hidden, action_dim)
    return dict(w1=w1, b1=b1, w2=w2, b2=b2, wm=wm, bm=bm, ws=ws, bs=bs)


def prepare_params(p, action_dim):
    """One-time weight prep: pad hidden to 128, fuse the two heads into a
    [128, 2*action_dim] matmul, cast weights to bf16, build clamp-bound rows."""
    state_dim = p["w1"].shape[0]
    hp = HIDDEN_PAD
    out_w = 2 * action_dim

    w1 = jnp.zeros((state_dim, hp), jnp.float32).at[:, :HIDDEN].set(p["w1"])
    b1 = jnp.zeros((1, hp), jnp.float32).at[:, :HIDDEN].set(p["b1"])
    w2 = jnp.zeros((hp, hp), jnp.float32).at[:HIDDEN, :HIDDEN].set(p["w2"])
    b2 = jnp.zeros((1, hp), jnp.float32).at[:, :HIDDEN].set(p["b2"])

    wh = jnp.zeros((hp, out_w), jnp.float32)
    wh = wh.at[:HIDDEN, :action_dim].set(p["wm"])
    wh = wh.at[:HIDDEN, action_dim:].set(p["ws"])
    bh = jnp.concatenate([p["bm"], p["bs"]], axis=1)          # f32 [1, 2*ad]

    # Clamp bounds: no-op on mean lanes, (-20, 2) on log_std lanes.
    lo = jnp.full((1, out_w), -jnp.inf, jnp.float32).at[:, action_dim:].set(-20.0)
    hi = jnp.full((1, out_w), jnp.inf, jnp.float32).at[:, action_dim:].set(2.0)

    return dict(
        w1=w1.astype(jnp.bfloat16), b1=b1,
        w2=w2.astype(jnp.bfloat16), b2=b2,
        wh=wh.astype(jnp.bfloat16), bh=bh,
        lo=lo, hi=hi)


def actor_forward(state, prepared, action_dim, *, block_b=2048):
    """state: [B, state_dim] float; prepared: output of prepare_params.
    Returns (mean, log_std), each [B, action_dim] float32."""
    B, state_dim = state.shape
    hp = prepared["w1"].shape[1]
    out_w = 2 * action_dim

    # bf16 input halves the per-tile state DMA and feeds the MXU natively.
    if state.dtype != jnp.bfloat16:
        state = state.astype(jnp.bfloat16)

    # Batch tile: one full-batch block when it fits (block dims == full dims,
    # no padding / no ragged edge); otherwise block_b (multiple of 16 for bf16
    # sublane packing) with a Pallas-masked ragged trailing block.
    tb = B if B <= block_b else block_b
    if B >= 32:
        # v7x: guarantee >= 2 parallel grid steps so both TensorCores are used.
        tb = min(tb, _round_up(pl.cdiv(B, 2), 16))
    grid = (pl.cdiv(B, tb),)

    flops = 2 * B * (state_dim * hp + hp * hp + hp * out_w)
    bytes_accessed = (
        2 * B * state_dim                                     # bf16 state read
        + 4 * B * out_w                                       # f32 output write
        + 2 * (state_dim * hp + hp * hp + hp * out_w)         # bf16 weights
        + 4 * (2 * hp + 3 * out_w))                           # f32 biases + bounds

    out = pl.pallas_call(
        _actor_kernel,
        out_shape=jax.ShapeDtypeStruct((B, out_w), jnp.float32),
        grid_spec=pltpu.PrefetchScalarGridSpec(
            num_scalar_prefetch=0,
            grid=grid,
            in_specs=[
                pl.BlockSpec((tb, state_dim), lambda i: (i, 0)),   # state tile
                pl.BlockSpec((state_dim, hp), lambda i: (0, 0)),   # W1 (resident)
                pl.BlockSpec((1, hp), lambda i: (0, 0)),           # b1
                pl.BlockSpec((hp, hp), lambda i: (0, 0)),          # W2
                pl.BlockSpec((1, hp), lambda i: (0, 0)),           # b2
                pl.BlockSpec((hp, out_w), lambda i: (0, 0)),       # fused heads W
                pl.BlockSpec((1, out_w), lambda i: (0, 0)),        # fused heads b
                pl.BlockSpec((1, out_w), lambda i: (0, 0)),        # clamp lower
                pl.BlockSpec((1, out_w), lambda i: (0, 0)),        # clamp upper
            ],
            out_specs=pl.BlockSpec((tb, out_w), lambda i: (i, 0)),
        ),
        compiler_params=pltpu.CompilerParams(
            dimension_semantics=("parallel",),
        ),
        cost_estimate=pl.CostEstimate(
            flops=flops, transcendentals=0, bytes_accessed=bytes_accessed),
    )(state,
      prepared["w1"], prepared["b1"],
      prepared["w2"], prepared["b2"],
      prepared["wh"], prepared["bh"],
      prepared["lo"], prepared["hi"])

    mean = out[:, :action_dim]
    log_std = out[:, action_dim:]
    return mean, log_std


def actor_forward_ref(state, p):
    """Pure-JAX f32 reference (unpadded weights) for correctness check."""
    h1 = jnp.maximum(state @ p["w1"] + p["b1"], 0.0)
    h2 = jnp.maximum(h1 @ p["w2"] + p["b2"], 0.0)
    mean = h2 @ p["wm"] + p["bm"]
    log_std = jnp.clip(h2 @ p["ws"] + p["bs"], -20.0, 2.0)
    return mean, log_std


# TODO(synk): Actor.sample() (Normal rsample, tanh squashing, log_prob) is not
# implemented here; only forward() is translated to a Pallas kernel.

if __name__ == "__main__":
    key = jax.random.PRNGKey(0)
    k_state, k_params = jax.random.split(key)

    B, state_dim, action_dim = 4, 8, 4

    state = jax.random.normal(k_state, (B, state_dim), jnp.float32)
    params = init_params(k_params, state_dim, action_dim)
    prepared = prepare_params(params, action_dim)

    mean, log_std = actor_forward(state, prepared, action_dim)
    jax.block_until_ready((mean, log_std))

    mean_ref, log_std_ref = actor_forward_ref(state, params)
    assert mean.shape == (B, action_dim) and log_std.shape == (B, action_dim)
    # bf16 matmul operands -> loosened tolerance vs. the f32 reference.
    assert jnp.allclose(mean, mean_ref, atol=5e-2, rtol=5e-2), float(
        jnp.max(jnp.abs(mean - mean_ref)))
    assert jnp.allclose(log_std, log_std_ref, atol=5e-2, rtol=5e-2), float(
        jnp.max(jnp.abs(log_std - log_std_ref)))

    print("KERNEL_OK")
</pallas_src>

<mosaic_0001>
module attributes {stable_mosaic.version = 11 : i64} {
  func.func @_actor_kernel(%arg0: i32, %arg1: memref<4x8xbf16, #tpu.memory_space<vmem>>, %arg2: memref<8x128xbf16, #tpu.memory_space<vmem>>, %arg3: memref<1x128xf32, #tpu.memory_space<vmem>>, %arg4: memref<128x128xbf16, #tpu.memory_space<vmem>>, %arg5: memref<1x128xf32, #tpu.memory_space<vmem>>, %arg6: memref<128x8xbf16, #tpu.memory_space<vmem>>, %arg7: memref<1x8xf32, #tpu.memory_space<vmem>>, %arg8: memref<1x8xf32, #tpu.memory_space<vmem>>, %arg9: memref<1x8xf32, #tpu.memory_space<vmem>>, %arg10: memref<4x8xf32, #tpu.memory_space<vmem>>) attributes {dimension_semantics = [#tpu.dimension_semantics<parallel>], iteration_bounds = array<i64: 1>, scalar_prefetch = 0 : i64, scratch_operands = 0 : i64, tpu.core_type = #tpu.core_type<tc>, window_params = [{transform_indices = @transform_0, window_bounds = array<i64: 4, 8>}, {pipeline_mode = #tpu.pipeline_mode<synchronous>, transform_indices = @transform_1, window_bounds = array<i64: 8, 128>}, {pipeline_mode = #tpu.pipeline_mode<synchronous>, transform_indices = @transform_2, window_bounds = array<i64: 1, 128>}, {pipeline_mode = #tpu.pipeline_mode<synchronous>, transform_indices = @transform_3, window_bounds = array<i64: 128, 128>}, {pipeline_mode = #tpu.pipeline_mode<synchronous>, transform_indices = @transform_4, window_bounds = array<i64: 1, 128>}, {pipeline_mode = #tpu.pipeline_mode<synchronous>, transform_indices = @transform_5, window_bounds = array<i64: 128, 8>}, {pipeline_mode = #tpu.pipeline_mode<synchronous>, transform_indices = @transform_6, window_bounds = array<i64: 1, 8>}, {pipeline_mode = #tpu.pipeline_mode<synchronous>, transform_indices = @transform_7, window_bounds = array<i64: 1, 8>}, {pipeline_mode = #tpu.pipeline_mode<synchronous>, transform_indices = @transform_8, window_bounds = array<i64: 1, 8>}, {transform_indices = @transform_9, window_bounds = array<i64: 4, 8>}]} {
    %c0 = arith.constant 0 : index
    %c0_0 = arith.constant 0 : index
    %0 = vector.load %arg1[%c0, %c0_0] : memref<4x8xbf16, #tpu.memory_space<vmem>>, vector<4x8xbf16>
    %c0_1 = arith.constant 0 : index
    %c0_2 = arith.constant 0 : index
    %1 = vector.load %arg2[%c0_1, %c0_2] : memref<8x128xbf16, #tpu.memory_space<vmem>>, vector<8x128xbf16>
    %cst = arith.constant dense<0.000000e+00> : vector<4x128xf32>
    %2 = tpu.matmul %0, %1, %cst {dimension_numbers = #tpu.dot_dimension_numbers<[1], [0], [0], [1], [0, 0, 1, 1], [], []>} : vector<4x8xbf16>, vector<8x128xbf16>, vector<4x128xf32> -> vector<4x128xf32>
    %c0_3 = arith.constant 0 : index
    %c0_4 = arith.constant 0 : index
    %3 = vector.load %arg3[%c0_3, %c0_4] : memref<1x128xf32, #tpu.memory_space<vmem>>, vector<1x128xf32>
    %4 = vector.broadcast %3 : vector<1x128xf32> to vector<4x128xf32>
    %5 = arith.addf %2, %4 : vector<4x128xf32>
    %cst_5 = arith.constant 0.000000e+00 : f32
    %6 = vector.broadcast %cst_5 : f32 to vector<4x128xf32>
    %7 = arith.maximumf %5, %6 : vector<4x128xf32>
    %8 = arith.truncf %7 : vector<4x128xf32> to vector<4x128xbf16>
    %c0_6 = arith.constant 0 : index
    %c0_7 = arith.constant 0 : index
    %9 = vector.load %arg4[%c0_6, %c0_7] : memref<128x128xbf16, #tpu.memory_space<vmem>>, vector<128x128xbf16>
    %cst_8 = arith.constant dense<0.000000e+00> : vector<4x128xf32>
    %10 = tpu.matmul %8, %9, %cst_8 {dimension_numbers = #tpu.dot_dimension_numbers<[1], [0], [0], [1], [0, 0, 1, 1], [], []>} : vector<4x128xbf16>, vector<128x128xbf16>, vector<4x128xf32> -> vector<4x128xf32>
    %c0_9 = arith.constant 0 : index
    %c0_10 = arith.constant 0 : index
    %11 = vector.load %arg5[%c0_9, %c0_10] : memref<1x128xf32, #tpu.memory_space<vmem>>, vector<1x128xf32>
    %12 = vector.broadcast %11 : vector<1x128xf32> to vector<4x128xf32>
    %13 = arith.addf %10, %12 : vector<4x128xf32>
    %cst_11 = arith.constant 0.000000e+00 : f32
    %14 = vector.broadcast %cst_11 : f32 to vector<4x128xf32>
    %15 = arith.maximumf %13, %14 : vector<4x128xf32>
    %16 = arith.truncf %15 : vector<4x128xf32> to vector<4x128xbf16>
    %c0_12 = arith.constant 0 : index
    %c0_13 = arith.constant 0 : index
    %17 = vector.load %arg6[%c0_12, %c0_13] : memref<128x8xbf16, #tpu.memory_space<vmem>>, vector<128x8xbf16>
    %cst_14 = arith.constant dense<0.000000e+00> : vector<4x8xf32>
    %18 = tpu.matmul %16, %17, %cst_14 {dimension_numbers = #tpu.dot_dimension_numbers<[1], [0], [0], [1], [0, 0, 1, 1], [], []>} : vector<4x128xbf16>, vector<128x8xbf16>, vector<4x8xf32> -> vector<4x8xf32>
    %c0_15 = arith.constant 0 : index
    %c0_16 = arith.constant 0 : index
    %19 = vector.load %arg7[%c0_15, %c0_16] : memref<1x8xf32, #tpu.memory_space<vmem>>, vector<1x8xf32>
    %20 = vector.broadcast %19 : vector<1x8xf32> to vector<4x8xf32>
    %21 = arith.addf %18, %20 : vector<4x8xf32>
    %c0_17 = arith.constant 0 : index
    %c0_18 = arith.constant 0 : index
    %22 = vector.load %arg8[%c0_17, %c0_18] : memref<1x8xf32, #tpu.memory_space<vmem>>, vector<1x8xf32>
    %23 = vector.broadcast %22 : vector<1x8xf32> to vector<4x8xf32>
    %24 = arith.maximumf %21, %23 : vector<4x8xf32>
    %c0_19 = arith.constant 0 : index
    %c0_20 = arith.constant 0 : index
    %25 = vector.load %arg9[%c0_19, %c0_20] : memref<1x8xf32, #tpu.memory_space<vmem>>, vector<1x8xf32>
    %26 = vector.broadcast %25 : vector<1x8xf32> to vector<4x8xf32>
    %27 = arith.minimumf %24, %26 : vector<4x8xf32>
    %c0_21 = arith.constant 0 : index
    %c0_22 = arith.constant 0 : index
    %28 = vector.load %arg10[%c0_21, %c0_22] : memref<4x8xf32, #tpu.memory_space<vmem>>, vector<4x8xf32>
    tpu.vector_store %arg10[%c0_21, %c0_22], %27 {strides = array<i32>} : memref<4x8xf32, #tpu.memory_space<vmem>>, vector<4x8xf32>,
    return
  }
  func.func @transform_0(%arg0: i32) -> (i32, i32) {
    %c0_i32 = arith.constant 0 : i32
    %c0_i32_0 = arith.constant 0 : i32
    return %arg0, %c0_i32 : i32, i32
  }
  func.func @transform_1(%arg0: i32) -> (i32, i32) {
    %c0_i32 = arith.constant 0 : i32
    %c0_i32_0 = arith.constant 0 : i32
    %c0_i32_1 = arith.constant 0 : i32
    return %c0_i32, %c0_i32_0 : i32, i32
  }
  func.func @transform_2(%arg0: i32) -> (i32, i32) {
    %c0_i32 = arith.constant 0 : i32
    %c0_i32_0 = arith.constant 0 : i32
    %c0_i32_1 = arith.constant 0 : i32
    return %c0_i32, %c0_i32_0 : i32, i32
  }
  func.func @transform_3(%arg0: i32) -> (i32, i32) {
    %c0_i32 = arith.constant 0 : i32
    %c0_i32_0 = arith.constant 0 : i32
    %c0_i32_1 = arith.constant 0 : i32
    return %c0_i32, %c0_i32_0 : i32, i32
  }
  func.func @transform_4(%arg0: i32) -> (i32, i32) {
    %c0_i32 = arith.constant 0 : i32
    %c0_i32_0 = arith.constant 0 : i32
    %c0_i32_1 = arith.constant 0 : i32
    return %c0_i32, %c0_i32_0 : i32, i32
  }
  func.func @transform_5(%arg0: i32) -> (i32, i32) {
    %c0_i32 = arith.constant 0 : i32
    %c0_i32_0 = arith.constant 0 : i32
    %c0_i32_1 = arith.constant 0 : i32
    return %c0_i32, %c0_i32_0 : i32, i32
  }
  func.func @transform_6(%arg0: i32) -> (i32, i32) {
    %c0_i32 = arith.constant 0 : i32
    %c0_i32_0 = arith.constant 0 : i32
    %c0_i32_1 = arith.constant 0 : i32
    return %c0_i32, %c0_i32_0 : i32, i32
  }
  func.func @transform_7(%arg0: i32) -> (i32, i32) {
    %c0_i32 = arith.constant 0 : i32
    %c0_i32_0 = arith.constant 0 : i32
    %c0_i32_1 = arith.constant 0 : i32
    return %c0_i32, %c0_i32_0 : i32, i32
  }
  func.func @transform_8(%arg0: i32) -> (i32, i32) {
    %c0_i32 = arith.constant 0 : i32
    %c0_i32_0 = arith.constant 0 : i32
    %c0_i32_1 = arith.constant 0 : i32
    return %c0_i32, %c0_i32_0 : i32, i32
  }
  func.func @transform_9(%arg0: i32) -> (i32, i32) {
    %c0_i32 = arith.constant 0 : i32
    %c0_i32_0 = arith.constant 0 : i32
    return %arg0, %c0_i32 : i32, i32
  }
}

</mosaic_0001>

<bundles_post_ra>
// kernel: tpu_custom_call.1
= control target key start
LH: loop header
LB: loop body
LE: loop exit
PB: predicated region body
PF: predicated region fallthrough
CT: control target
= control target key end

     0   :  { %14 = vsyncpa [#allocation3], 0  ;;  %s616_s0 = inlined_call_operand.hbm [shape: bf16[4,8], index: 0, kind: input, shape index: {}]   ;;  %s617_s1 = inlined_call_operand.vmem [shape: bf16[8,128], index: 1, kind: input, shape index: {}]   ;;  %s618_s2 = inlined_call_operand.hbm [shape: f32[1,128], index: 2, kind: input, shape index: {}]   ;;  %s619_s3 = inlined_call_operand.vmem [shape: bf16[128,128], index: 3, kind: input, shape index: {}]   ;;  %s620_s4 = inlined_call_operand.hbm [shape: f32[1,128], index: 4, kind: input, shape index: {}]   ;;  %s621_s5 = inlined_call_operand.vmem [shape: bf16[128,8], index: 5, kind: input, shape index: {}]   ;;  %s622_s6 = inlined_call_operand.vmem [shape: f32[1,8], index: 6, kind: input, shape index: {}]   ;;  %s623_s7 = inlined_call_operand.vmem [shape: f32[1,8], index: 7, kind: input, shape index: {}]   ;;  %s624_s8 = inlined_call_operand.vmem [shape: f32[1,8], index: 8, kind: input, shape index: {}]   ;;  %s625_s9 = inlined_call_operand.hbm [shape: f32[4,8], index: 9, kind: output, shape index: {}]  }
   0x1   :  { %15 = vsyncpa [#allocation6], 0  ;;  %s35_s11 = sshll.u32 %s618_s2, 4  ;;  %s36_s11 = int_to_ptr.hbm [resolvable:$true] %s35_s11 }
   0x2   :  { %16 = vsyncpa [#allocation4], 0  ;;  %s490_s12 = smov [#allocation5]   ;;  %s22_s16 = sshll.u32 %s616_s0, 4  ;;  %s23_s16 = int_to_ptr.hbm [resolvable:$true] %s22_s16 }
   0x3   :  { %s37_s13 = sshll.u32 %s490_s12, 4  ;;  %s491_s17 = smov [#allocation2]   ;;  %s38_s13 = int_to_ptr.vmem [resolvable:$true] %s37_s13 }
   0x4   :  { %40 = dma.hbm_to_vmem [thread:$0]  %s36_s11, 16, %s38_s13, [#allocation6]  }
   0x5   :  { %s24_s18 = sshll.u32 %s491_s17, 4  ;;  %s48_s21 = sshll.u32 %s620_s4, 4  ;;  %s25_s18 = int_to_ptr.vmem [resolvable:$true] %s24_s18  ;;  %s49_s21 = int_to_ptr.hbm [resolvable:$true] %s48_s21 }
   0x6   :  { %27 = dma.hbm_to_vmem [thread:$0]  %s23_s16, 32, %s25_s18, [#allocation3]  }
   0x7   :  { %s492_s2 = smov [#allocation7]  }
   0x8   :  { %s50_s22 = sshll.u32 %s492_s2, 4  ;;  %s51_s22 = int_to_ptr.vmem [resolvable:$true] %s50_s22 }
   0x9   :  { %53 = dma.hbm_to_vmem [thread:$0]  %s49_s21, 16, %s51_s22, [#allocation6]  }
   0xa   :  { %484 = dma.done.wait [#allocation3], 32  }
   0xb   :  { %485 = vsyncadd [#allocation3], 4294967264 }
   0xc   :  { %486 = dma.done.wait [#allocation6], 32  }
   0xd   :  { %487 = vsyncadd [#allocation6], 4294967264  ;;  %vm85_vm0 = vcmask 1043456   ;;  %v76_v0 = vld [vmem:[%s617_s1] sm:$0xf]  ;;  %v370_v1 = vld [vmem:[%s619_s3 + $0x38] sm:$0xff] }
   0xe   :  { %v87_v2 = vsel %vm85_vm0, %v76_v0, 0  ;;  %v75_v3 = vld [vmem:[#allocation2] sm:$0x3]  ;;  %vm81_vm1 = vcmask 64512   ;;  %172 = vmatpush.bf16.msra.mxu1 %v370_v1  ;;  %v369_v4 = vld [vmem:[%s619_s3 + $0x30] sm:$0xff]  ;;  %v368_v5 = vld [vmem:[%s619_s3 + $0x28] sm:$0xff] }
   0xf   :  { %96 = vmatpush.bf16.msra.mxu0 %v87_v2  ;;  %v367_v6 = vld [vmem:[%s619_s3 + $0x20] sm:$0xff]  ;;  %v366_v7 = vld [vmem:[%s619_s3 + $0x18] sm:$0xff]  ;;  %v365_v8 = vld [vmem:[%s619_s3 + $0x10] sm:$0xff]  ;;  %s493_s12 = smov [#allocation8]   ;;  %s287_s16 = sshll.u32 %s625_s9, 4  ;;  %vm278_vm2 = vcmask 60416   ;;  %s288_s16 = int_to_ptr.hbm [resolvable:$true] %s287_s16 }
  0x10   :  { %v364_v9 = vld [vmem:[%s619_s3 + $0x8] sm:$0xff]  ;;  %v363_v10 = vld [vmem:[%s619_s3] sm:$0xff]  ;;  %v378_v11 = vld [vmem:[%s621_s5 + $0x38] sm:$0xff]  ;;  %s285_s13 = sshll.u32 %s493_s12, 4  ;;  %s286_s13 = int_to_ptr.vmem [resolvable:$true] %s285_s13 }
  0x11   :  { %255 = vmatpush.bf16.msra.mxu2 %v378_v11  ;;  %v377_v12 = vld [vmem:[%s621_s5 + $0x30] sm:$0xff]  ;;  %v376_v13 = vld [vmem:[%s621_s5 + $0x28] sm:$0xff]  ;;  %v375_v14 = vld [vmem:[%s621_s5 + $0x20] sm:$0xff] }
  0x12   :  { %298 = vmatmul.msk.bf16.vlgmr.msra.gmra.mxu0 %vm81_vm1, %v75_v3  ;;  %173 = vmatpush.bf16.msra.mxu1 %v369_v4  ;;  %v374_v15 = vld [vmem:[%s621_s5 + $0x18] sm:$0xff]  ;;  %v373_v16 = vld [vmem:[%s621_s5 + $0x10] sm:$0xff]  ;;  %v383_v17 = vld [vmem:[#allocation5] ss:$0 sm:$0xff] }
  0x13   :  { %v372_v23 = vld [vmem:[%s621_s5 + $0x8] sm:$0xff]  ;;  %v371_v24 = vld [vmem:[%s621_s5] sm:$0xff] }
  0x14   :  { %v384_v25 = vld [vmem:[#allocation7] ss:$0 sm:$0xff]  ;;  %v385_v31 = vld [vmem:[%s622_s6] ss:$0 sm:$0xff] }
  0x15   :  { %256 = vmatpush.bf16.msra.mxu2 %v377_v12  ;;  %v386_v32 = vld [vmem:[%s623_s7] ss:$0 sm:$0xff] }
  0x16   :  { %174 = vmatpush.bf16.msra.mxu1 %v368_v5  ;;  %v387_v35 = vld [vmem:[%s624_s8] ss:$0 sm:$0xff] }
  0x19   :  { %257 = vmatpush.bf16.msra.mxu2 %v376_v13 }
  0x1a   :  { %175 = vmatpush.bf16.msra.mxu1 %v367_v6 }
  0x1d   :  { %258 = vmatpush.bf16.msra.mxu2 %v375_v14 }
  0x1e   :  { %176 = vmatpush.bf16.msra.mxu1 %v366_v7 }
  0x21   :  { %259 = vmatpush.bf16.msra.mxu2 %v374_v15 }
  0x22   :  { %177 = vmatpush.bf16.msra.mxu1 %v365_v8 }
  0x25   :  { %260 = vmatpush.bf16.msra.mxu2 %v373_v16 }
  0x26   :  { %178 = vmatpush.bf16.msra.mxu1 %v364_v9 }
  0x29   :  { %261 = vmatpush.bf16.msra.mxu2 %v372_v23 }
  0x2a   :  { %179 = vmatpush.bf16.msra.mxu1 %v363_v10 }
  0x2d   :  { %262 = vmatpush.bf16.msra.mxu2 %v371_v24 }
  0x8f   :  { %v98_v18 = vpop.f32.mrf.mxu0 }
  0x90   :  { %v99_v19 = vadd.f32 %v383_v17, %v98_v18 }
  0x92   :  { %v102_v20 = vmax.f32 %v99_v19, 0.0 }
  0x94   :  { %v103_v21 = vpack.c.bf16 %v102_v20, %v102_v20 }
  0x96   :  { %180 = vmatmul.bf16.vlgmr.msra.gmra.mxu1 %v103_v21 }
  0x97   :  { %v100_v22 = vpop.f32.mrf.mxu0 }
 0x113   :  { %v181_v26 = vpop.f32.mrf.mxu1 }
 0x114   :  { %v182_v27 = vadd.f32 %v384_v25, %v181_v26 }
 0x116   :  { %v185_v28 = vmax.f32 %v182_v27, 0.0 }
 0x118   :  { %v186_v29 = vpack.c.bf16 %v185_v28, %v185_v28 }
 0x11a   :  { %263 = vmatmul.bf16.vlgmr.msra.gmra.mxu2 %v186_v29 }
 0x11b   :  { %v183_v30 = vpop.f32.mrf.mxu1 }
 0x19d   :  { %v264_v33 = vpop.f32.mrf.mxu2 }
 0x19e   :  { %v265_v34 = vadd.f32 %v385_v31, %v264_v33 }
 0x1a0   :  { %v272_v36 = vmax.f32 %v265_v34, %v386_v32 }
 0x1a2   :  { %v277_v37 = vmin.f32 %v272_v36, %v387_v35 }
 0x1a4   :  { %279 = vst.msk [vmem:[#allocation8] sm:$0xf] %vm278_vm2, %v277_v37 }
 0x1a5   :  { %v266_v38 = vpop.f32.mrf.mxu2  ;;  %290 = dma.vmem_to_hbm [thread:$0]  %s286_s13, 64, %s288_s16, [#allocation4]  }
 0x1a6   :  { %488 = dma.done.wait [#allocation4], 64  }
 0x1a7   :  { %489 = vsyncadd [#allocation4], 4294967232 }
 0x1a8   :  { %295 = vsyncpa [#allocation3], 1 }
 0x1a9   :  { %296 = vsyncpa [#allocation6], 1 }
 0x1aa   :  { %297 = vsyncpa [#allocation4], 1 }

</bundles_post_ra>
